<compile_context>
chip_gen: v7x
topology: tpu7x:2x2x1
jax: 0.10.0
libtpu: 0.0.40
codegen_flags: <defaults>
</compile_context>

<pallas_src>
import functools

import jax
import jax.numpy as jnp
from jax.experimental import pallas as pl
from jax.experimental.pallas import tpu as pltpu


def timm_model_kernel(wave_ref, cwt_ref, cb_ref, metat_ref,
                      w1ft_ref, w1mt_ref, b1_ref, w2_ref, b2_ref,
                      out_ref, acc_ref, *, inv_hw, compute_dtype):
    """One (batch b, spatial tile s) grid step. Spatial axis must stay innermost."""
    s = pl.program_id(1)

    @pl.when(s == 0)
    def _():
        acc_ref[...] = jnp.zeros_like(acc_ref)

    # Synthetic backbone tile: pointwise conv as [F, C] @ [C, L] (lane-dense on
    # the big spatial axis) + bias + ReLU.  MXU accumulates in f32.
    wv = wave_ref[...]
    if jnp.dtype(compute_dtype) != jnp.dtype(jnp.float32):
        wv = wv.astype(compute_dtype)          # in-kernel cast; HBM stream stays f32
    z = jnp.dot(cwt_ref[...], wv, preferred_element_type=jnp.float32)   # [F, L]
    z = jnp.maximum(z + cb_ref[...], 0.0)

    # Pooled-sum accumulation: plain VPU adds of 128-lane blocks into the
    # (F, 128) accumulator; the cross-lane reduce is deferred to finalize.
    tile_cols = z.shape[1]
    nb, rem = divmod(tile_cols, 128)
    part = acc_ref[...]
    for j in range(nb):
        part = part + z[:, j * 128:(j + 1) * 128]
    acc_ref[...] = part
    if rem:
        # Only reachable when H*W is not a multiple of 128 (full-extent tile).
        acc_ref[:, 0:1] = acc_ref[:, 0:1] + jnp.sum(z[:, nb * 128:], axis=1,
                                                    keepdims=True)

    @pl.when(s == pl.num_programs(1) - 1)
    def _():
        # Global average pool: single cross-lane XLU reduce, once per batch row.
        feat = jnp.sum(acc_ref[...], axis=1, keepdims=True) * inv_hw     # [F, 1]
        # concat([feat, meta]) @ W1 == W1_feat^T @ feat + W1_meta^T @ meta
        # (column orientation -> no in-kernel transpose of feat is needed).
        h = (jnp.dot(w1ft_ref[...], feat, preferred_element_type=jnp.float32)
             + jnp.dot(w1mt_ref[...], metat_ref[...],
                       preferred_element_type=jnp.float32)
             + b1_ref[...])
        h = jnp.maximum(h, 0.0)                                          # [hidden, 1]
        # linear2 has out_features == 1: VPU multiply + sublane reduce instead
        # of a 1-column MXU matmul.
        logit = jnp.sum(h * w2_ref[...], axis=0, keepdims=True) + b2_ref[0, 0]
        out_ref[...] = jax.nn.sigmoid(logit)                             # [1, 1]


def _round_up(x, m):
    return ((x + m - 1) // m) * m


def _streamed_tile_bytes(tile_cols, C, Fdim):
    """Padded VMEM bytes of the per-step streamed data: double-buffered f32
    wave tile + f32 conv-activation slab + pooled-sum accumulator."""
    cols = _round_up(tile_cols, 128)
    wave_tile = 2 * _round_up(C, 8) * cols * 4
    z_tile = _round_up(Fdim, 8) * cols * 4
    acc = _round_up(Fdim, 8) * 128 * 4
    return wave_tile + z_tile + acc


def _weight_block_bytes(C, Fdim, hidden, M, w_itemsize):
    """Padded VMEM bytes of the grid-invariant blocks (counted double-buffered
    as the worst case)."""
    pad = lambda r, c, b: _round_up(max(r, 1), 8) * _round_up(max(c, 1), 128) * b
    per_buf = (pad(Fdim, C, w_itemsize) + pad(Fdim, 1, 4)        # conv_w^T, conv_b
               + pad(hidden, Fdim, 4) + pad(hidden, M, 4)        # w1_feat^T, w1_meta^T
               + 2 * pad(hidden, 1, 4)                           # b1, w2
               + pad(M, 1, 4))                                   # meta column
    return 2 * per_buf


def _vmem_capacity_bytes():
    try:
        return int(pltpu.get_tpu_info().vmem_capacity_bytes)
    except Exception:
        return 64 * 1024 * 1024   # conservative fallback: v7x per-core VMEM


def _pick_tile_cols(hw, budget_bytes, C, Fdim, max_cols):
    """Largest multiple-of-128 spatial tile that divides HW and fits the padded
    VMEM budget (min 128)."""
    if hw % 128 == 0:
        cap = max(128, min(hw, max_cols))
        best = 128
        for cols in range(128, cap + 1, 128):
            if hw % cols == 0 and _streamed_tile_bytes(cols, C, Fdim) <= budget_bytes:
                best = cols
        return best
    # TODO(synk): HW with no multiple-of-128 divisor falls back to one
    # full-extent block; tiling such shapes would need tail padding + masking
    # (padded zeros pass through relu(bias) != 0 and would corrupt the mean).
    return hw


def timm_model_forward(wave_nchw, meta, params, *, compute_dtype=jnp.float32,
                       max_block_cols=4096):
    """wave_nchw: [B, C, H, W] float32 (PyTorch layout), meta: [B, M]."""
    B, C, H, W = wave_nchw.shape
    HW = H * W
    M = meta.shape[1]
    Fdim = params["conv_w"].shape[1]
    hidden = params["w1_feat"].shape[1]

    # NCHW-native: [B, C, H*W] is a free, contiguous reshape (no transpose pass,
    # no host-side dtype cast -> wave is streamed from HBM exactly once).
    wave3 = wave_nchw.reshape(B, C, HW)
    metat = meta.reshape(B, M, 1)                                   # per-batch column

    # Tiny weights: pre-transpose / reshape to column orientation on host.
    cwt = params["conv_w"].T.astype(compute_dtype)                  # [F, C]
    cb_col = params["conv_b"].reshape(Fdim, 1)                      # [F, 1]
    w1ft = params["w1_feat"].T                                      # [hidden, F]
    w1mt = params["w1_meta"].T                                      # [hidden, M]
    b1_col = params["b1"].reshape(hidden, 1)                        # [hidden, 1]
    w2_col = params["w2"].reshape(hidden, 1)                        # [hidden, 1]
    b2_s = params["b2"].reshape(1, 1)                               # SMEM scalar

    # Per-generation VMEM sizing (128 MiB on v5e/v6e, 64 MiB per core on v7x).
    vmem_cap = _vmem_capacity_bytes()
    vmem_limit = max(16 << 20, min((vmem_cap * 5) // 8, 96 << 20))
    weight_bytes = _weight_block_bytes(C, Fdim, hidden, M,
                                       jnp.dtype(compute_dtype).itemsize)
    tile_budget = max(vmem_limit - weight_bytes - (2 << 20), 2 << 20)

    tile_cols = _pick_tile_cols(HW, tile_budget, C, Fdim, max_block_cols)
    n_spatial = HW // tile_cols

    kernel = functools.partial(timm_model_kernel, inv_hw=1.0 / HW,
                               compute_dtype=compute_dtype)

    flops = (2 * B * HW * C * Fdim + 2 * B * HW * Fdim
             + 2 * B * (Fdim + M) * hidden + 5 * B * hidden)
    bytes_accessed = (wave3.size * 4 + metat.size * 4
                      + cwt.size * jnp.dtype(compute_dtype).itemsize
                      + (cb_col.size + w1ft.size + w1mt.size + b1_col.size
                         + w2_col.size + b2_s.size) * 4
                      + B * 4)

    # TODO(synk): for B == 1 on v7x, split the spatial axis across the two
    # TensorCores (grid (B, 2, n_spatial//2) with per-core partial pooled sums)
    # so both cores stream HBM; with B >= 2 the "parallel" batch axis already
    # shards across cores.
    def _build(single_buffer_weights):
        def const_spec(shape):
            if single_buffer_weights:
                # Grid-invariant blocks: no need to double-buffer them.
                return pl.BlockSpec(shape, lambda b, s: (0, 0),
                                    pipeline_mode=pl.Buffered(1))
            return pl.BlockSpec(shape, lambda b, s: (0, 0))

        return pl.pallas_call(
            kernel,
            out_shape=jax.ShapeDtypeStruct((B, 1, 1), jnp.float32),
            grid=(B, n_spatial),
            in_specs=[
                pl.BlockSpec((None, C, tile_cols), lambda b, s: (b, 0, s)),  # wave tile
                const_spec((Fdim, C)),                                       # conv_w^T
                const_spec((Fdim, 1)),                                       # conv_b col
                pl.BlockSpec((None, M, 1), lambda b, s: (b, 0, 0)),          # meta col
                const_spec((hidden, Fdim)),                                  # w1_feat^T
                const_spec((hidden, M)),                                     # w1_meta^T
                const_spec((hidden, 1)),                                     # b1 col
                const_spec((hidden, 1)),                                     # w2 col
                pl.BlockSpec(memory_space=pltpu.MemorySpace.SMEM),           # b2 scalar
            ],
            out_specs=pl.BlockSpec((None, 1, 1), lambda b, s: (b, 0, 0)),
            scratch_shapes=[pltpu.VMEM((Fdim, 128), jnp.float32)],           # pooled sum
            compiler_params=pltpu.CompilerParams(
                dimension_semantics=("parallel", "arbitrary"),
                vmem_limit_bytes=int(vmem_limit)),
            cost_estimate=pl.CostEstimate(
                flops=int(flops), transcendentals=int(B),
                bytes_accessed=int(bytes_accessed)),
        )

    args = (wave3, cwt, cb_col, metat, w1ft, w1mt, b1_col, w2_col, b2_s)
    try:
        out3 = _build(True)(*args)
    except Exception:
        # Fallback: default (double-buffered) weight blocks.
        out3 = _build(False)(*args)
    return out3.reshape(B, 1)


def init_params(key, C, Fdim, M):
    hidden = Fdim // 4
    ks = jax.random.split(key, 7)
    u = lambda k, shape, fan_in: jax.random.uniform(
        k, shape, jnp.float32, -1.0, 1.0) / jnp.sqrt(jnp.float32(fan_in))
    return {
        "conv_w": u(ks[0], (C, Fdim), C),
        "conv_b": u(ks[1], (1, Fdim), C),
        "w1_feat": u(ks[2], (Fdim, hidden), Fdim + M),
        "w1_meta": u(ks[3], (M, hidden), Fdim + M),
        "b1": u(ks[4], (1, hidden), Fdim + M),
        "w2": u(ks[5], (1, hidden), hidden),   # PyTorch layout [out=1, in=hidden]
        "b2": u(ks[6], (1, 1), hidden),
    }


if __name__ == "__main__":
    B, C, H, W = 2, 4, 16, 16     # wave: NCHW like the PyTorch module
    Fdim = 32                     # synthetic backbone feature dim (in_feature)
    M = 8                         # meta features

    key = jax.random.PRNGKey(0)
    k_wave, k_meta, k_params = jax.random.split(key, 3)
    wave = jax.random.normal(k_wave, (B, C, H, W), jnp.float32)
    meta = jax.random.normal(k_meta, (B, M), jnp.float32)
    params = init_params(k_params, C, Fdim, M)

    # max_block_cols=128 -> 2 spatial grid steps at H*W=256: exercises the
    # accumulate-then-finalize path and the pipelined, lane-dense wave DMA.
    out = jax.block_until_ready(
        timm_model_forward(wave, meta, params, max_block_cols=128))

    # Pure-JAX reference.
    wave3_ref = wave.reshape(B, C, H * W)
    z = jnp.maximum(jnp.einsum("bcs,cf->bsf", wave3_ref, params["conv_w"])
                    + params["conv_b"], 0.0)
    feat = jnp.mean(z, axis=1)
    x = jnp.concatenate([feat, meta], axis=1)
    w1 = jnp.concatenate([params["w1_feat"], params["w1_meta"]], axis=0)
    h = jnp.maximum(x @ w1 + params["b1"], 0.0)
    ref = jax.nn.sigmoid(h @ params["w2"].T + params["b2"])

    assert out.shape == (B, 1)
    assert jnp.allclose(out, ref, atol=1e-5, rtol=1e-5)

    # Default tiling (single full-HW tile picked by the budget-aware search).
    out_default = jax.block_until_ready(timm_model_forward(wave, meta, params))
    assert jnp.allclose(out_default, ref, atol=1e-5, rtol=1e-5)

    # Optional bf16 MXU path: wave stays f32 in HBM and is cast in-kernel after
    # the DMA (no extra host HBM pass); fp32 accumulation, loose tolerance.
    out_bf16 = jax.block_until_ready(
        timm_model_forward(wave, meta, params, compute_dtype=jnp.bfloat16,
                           max_block_cols=128))
    assert jnp.allclose(out_bf16, ref, atol=5e-2, rtol=5e-2)

    print("KERNEL_OK")
</pallas_src>

<mosaic_0001>
module attributes {stable_mosaic.version = 11 : i64} {
  func.func @timm_model_kernel(%arg0: i32, %arg1: i32, %arg2: memref<1x4x128xf32, #tpu.memory_space<vmem>>, %arg3: memref<32x4xf32, #tpu.memory_space<vmem>>, %arg4: memref<32x1xf32, #tpu.memory_space<vmem>>, %arg5: memref<1x8x1xf32, #tpu.memory_space<vmem>>, %arg6: memref<8x32xf32, #tpu.memory_space<vmem>>, %arg7: memref<8x8xf32, #tpu.memory_space<vmem>>, %arg8: memref<8x1xf32, #tpu.memory_space<vmem>>, %arg9: memref<8x1xf32, #tpu.memory_space<vmem>>, %arg10: memref<1x1xf32, #tpu.memory_space<smem>>, %arg11: memref<1x1x1xf32, #tpu.memory_space<vmem>>, %arg12: memref<32x128xf32, #tpu.memory_space<vmem>>) attributes {dimension_semantics = [#tpu.dimension_semantics<parallel>, #tpu.dimension_semantics<arbitrary>], iteration_bounds = array<i64: 2, 2>, scalar_prefetch = 0 : i64, scratch_operands = 1 : i64, tpu.core_type = #tpu.core_type<tc>, window_params = [{transform_indices = @transform_0, window_bounds = array<i64: 1, 4, 128>}, {pipeline_mode = #tpu.pipeline_mode<synchronous>, transform_indices = @transform_1, window_bounds = array<i64: 32, 4>}, {pipeline_mode = #tpu.pipeline_mode<synchronous>, transform_indices = @transform_2, window_bounds = array<i64: 32, 1>}, {transform_indices = @transform_3, window_bounds = array<i64: 1, 8, 1>}, {pipeline_mode = #tpu.pipeline_mode<synchronous>, transform_indices = @transform_4, window_bounds = array<i64: 8, 32>}, {pipeline_mode = #tpu.pipeline_mode<synchronous>, transform_indices = @transform_5, window_bounds = array<i64: 8, 8>}, {pipeline_mode = #tpu.pipeline_mode<synchronous>, transform_indices = @transform_6, window_bounds = array<i64: 8, 1>}, {pipeline_mode = #tpu.pipeline_mode<synchronous>, transform_indices = @transform_7, window_bounds = array<i64: 8, 1>}, {transform_indices = @transform_8, window_bounds = array<i64: 1, 1>}, {transform_indices = @transform_9, window_bounds = array<i64: 1, 1, 1>}]} {
    %c0_i32 = arith.constant 0 : i32
    %0 = arith.cmpi eq, %arg1, %c0_i32 : i32
    %1 = arith.extui %0 : i1 to i32
    %c0_i32_0 = arith.constant 0 : i32
    %2 = arith.cmpi ne, %1, %c0_i32_0 : i32
    scf.if %2 {
      %cst_13 = arith.constant 0.000000e+00 : f32
      %18 = vector.broadcast %cst_13 : f32 to vector<32x128xf32>
      %c0_14 = arith.constant 0 : index
      %c0_15 = arith.constant 0 : index
      %19 = vector.load %arg12[%c0_14, %c0_15] : memref<32x128xf32, #tpu.memory_space<vmem>>, vector<32x128xf32>
      tpu.vector_store %arg12[%c0_14, %c0_15], %18 {strides = array<i32>} : memref<32x128xf32, #tpu.memory_space<vmem>>, vector<32x128xf32>,
    } else {
    }
    %c0 = arith.constant 0 : index
    %c0_1 = arith.constant 0 : index
    %c0_2 = arith.constant 0 : index
    %3 = vector.load %arg2[%c0, %c0_1, %c0_2] : memref<1x4x128xf32, #tpu.memory_space<vmem>>, vector<1x4x128xf32>
    %4 = vector.shape_cast %3 : vector<1x4x128xf32> to vector<4x128xf32>
    %c0_3 = arith.constant 0 : index
    %c0_4 = arith.constant 0 : index
    %5 = vector.load %arg3[%c0_3, %c0_4] : memref<32x4xf32, #tpu.memory_space<vmem>>, vector<32x4xf32>
    %cst = arith.constant dense<0.000000e+00> : vector<32x128xf32>
    %6 = tpu.matmul %5, %4, %cst {dimension_numbers = #tpu.dot_dimension_numbers<[1], [0], [0], [1], [0, 0, 1, 1], [], []>} : vector<32x4xf32>, vector<4x128xf32>, vector<32x128xf32> -> vector<32x128xf32>
    %c0_5 = arith.constant 0 : index
    %c0_6 = arith.constant 0 : index
    %7 = vector.load %arg4[%c0_5, %c0_6] : memref<32x1xf32, #tpu.memory_space<vmem>>, vector<32x1xf32>
    %8 = vector.broadcast %7 : vector<32x1xf32> to vector<32x128xf32>
    %9 = arith.addf %6, %8 : vector<32x128xf32>
    %cst_7 = arith.constant 0.000000e+00 : f32
    %10 = vector.broadcast %cst_7 : f32 to vector<32x128xf32>
    %11 = arith.maximumf %9, %10 : vector<32x128xf32>
    %c0_8 = arith.constant 0 : index
    %c0_9 = arith.constant 0 : index
    %12 = vector.load %arg12[%c0_8, %c0_9] : memref<32x128xf32, #tpu.memory_space<vmem>>, vector<32x128xf32>
    %13 = arith.addf %12, %11 : vector<32x128xf32>
    %c0_10 = arith.constant 0 : index
    %c0_11 = arith.constant 0 : index
    %14 = vector.load %arg12[%c0_10, %c0_11] : memref<32x128xf32, #tpu.memory_space<vmem>>, vector<32x128xf32>
    tpu.vector_store %arg12[%c0_10, %c0_11], %13 {strides = array<i32>} : memref<32x128xf32, #tpu.memory_space<vmem>>, vector<32x128xf32>,
    %c1_i32 = arith.constant 1 : i32
    %15 = arith.cmpi eq, %arg1, %c1_i32 : i32
    %16 = arith.extui %15 : i1 to i32
    %c0_i32_12 = arith.constant 0 : i32
    %17 = arith.cmpi ne, %16, %c0_i32_12 : i32
    scf.if %17 {
      %c0_13 = arith.constant 0 : index
      %c0_14 = arith.constant 0 : index
      %18 = vector.load %arg12[%c0_13, %c0_14] : memref<32x128xf32, #tpu.memory_space<vmem>>, vector<32x128xf32>
      %cst_15 = arith.constant dense<0.000000e+00> : vector<32xf32>
      %19 = vector.multi_reduction <add>, %18, %cst_15 [1] : vector<32x128xf32> to vector<32xf32>
      %20 = vector.shape_cast %19 : vector<32xf32> to vector<32x1xf32>
      %cst_16 = arith.constant 3.906250e-03 : f32
      %21 = vector.broadcast %cst_16 : f32 to vector<32x1xf32>
      %22 = arith.mulf %20, %21 : vector<32x1xf32>
      %c0_17 = arith.constant 0 : index
      %c0_18 = arith.constant 0 : index
      %23 = vector.load %arg6[%c0_17, %c0_18] : memref<8x32xf32, #tpu.memory_space<vmem>>, vector<8x32xf32>
      %cst_19 = arith.constant dense<0.000000e+00> : vector<8x1xf32>
      %24 = tpu.matmul %23, %22, %cst_19 {dimension_numbers = #tpu.dot_dimension_numbers<[1], [0], [0], [1], [0, 0, 1, 1], [], []>} : vector<8x32xf32>, vector<32x1xf32>, vector<8x1xf32> -> vector<8x1xf32>
      %c0_20 = arith.constant 0 : index
      %c0_21 = arith.constant 0 : index
      %25 = vector.load %arg7[%c0_20, %c0_21] : memref<8x8xf32, #tpu.memory_space<vmem>>, vector<8x8xf32>
      %c0_22 = arith.constant 0 : index
      %c0_23 = arith.constant 0 : index
      %c0_24 = arith.constant 0 : index
      %26 = vector.load %arg5[%c0_22, %c0_23, %c0_24] : memref<1x8x1xf32, #tpu.memory_space<vmem>>, vector<1x8x1xf32>
      %27 = vector.shape_cast %26 : vector<1x8x1xf32> to vector<8x1xf32>
      %cst_25 = arith.constant dense<0.000000e+00> : vector<8x1xf32>
      %28 = tpu.matmul %25, %27, %cst_25 {dimension_numbers = #tpu.dot_dimension_numbers<[1], [0], [0], [1], [0, 0, 1, 1], [], []>} : vector<8x8xf32>, vector<8x1xf32>, vector<8x1xf32> -> vector<8x1xf32>
      %29 = arith.addf %24, %28 : vector<8x1xf32>
      %c0_26 = arith.constant 0 : index
      %c0_27 = arith.constant 0 : index
      %30 = vector.load %arg8[%c0_26, %c0_27] : memref<8x1xf32, #tpu.memory_space<vmem>>, vector<8x1xf32>
      %31 = arith.addf %29, %30 : vector<8x1xf32>
      %cst_28 = arith.constant 0.000000e+00 : f32
      %32 = vector.broadcast %cst_28 : f32 to vector<8x1xf32>
      %33 = arith.maximumf %31, %32 : vector<8x1xf32>
      %c0_29 = arith.constant 0 : index
      %c0_30 = arith.constant 0 : index
      %34 = vector.load %arg9[%c0_29, %c0_30] : memref<8x1xf32, #tpu.memory_space<vmem>>, vector<8x1xf32>
      %35 = arith.mulf %33, %34 : vector<8x1xf32>
      %cst_31 = arith.constant dense<0.000000e+00> : vector<1xf32>
      %36 = vector.multi_reduction <add>, %35, %cst_31 [0] : vector<8x1xf32> to vector<1xf32>
      %37 = vector.shape_cast %36 : vector<1xf32> to vector<1x1xf32>
      %c0_32 = arith.constant 0 : index
      %c0_33 = arith.constant 0 : index
      %38 = memref.load %arg10[%c0_32, %c0_33] : memref<1x1xf32, #tpu.memory_space<smem>>
      %39 = vector.broadcast %38 : f32 to vector<1x1xf32>
      %40 = arith.addf %37, %39 : vector<1x1xf32>
      %41 = arith.negf %40 : vector<1x1xf32>
      %42 = math.exp %41 : vector<1x1xf32>
      %cst_34 = arith.constant 1.000000e+00 : f32
      %43 = vector.broadcast %cst_34 : f32 to vector<1x1xf32>
      %44 = arith.addf %43, %42 : vector<1x1xf32>
      %45 = arith.divf %43, %44 : vector<1x1xf32>
      %c0_35 = arith.constant 0 : index
      %c0_36 = arith.constant 0 : index
      %c0_37 = arith.constant 0 : index
      %46 = vector.load %arg11[%c0_35, %c0_36, %c0_37] : memref<1x1x1xf32, #tpu.memory_space<vmem>>, vector<1x1x1xf32>
      %47 = vector.shape_cast %46 : vector<1x1x1xf32> to vector<1x1xf32>
      %48 = vector.shape_cast %45 : vector<1x1xf32> to vector<1x1x1xf32>
      tpu.vector_store %arg11[%c0_35, %c0_36, %c0_37], %48 {strides = array<i32>} : memref<1x1x1xf32, #tpu.memory_space<vmem>>, vector<1x1x1xf32>,
    } else {
    }
    return
  }
  func.func @transform_0(%arg0: i32, %arg1: i32) -> (i32, i32, i32) {
    %c0_i32 = arith.constant 0 : i32
    %c0_i32_0 = arith.constant 0 : i32
    return %arg0, %c0_i32, %arg1 : i32, i32, i32
  }
  func.func @transform_1(%arg0: i32, %arg1: i32) -> (i32, i32) {
    %c0_i32 = arith.constant 0 : i32
    %c0_i32_0 = arith.constant 0 : i32
    %c0_i32_1 = arith.constant 0 : i32
    return %c0_i32, %c0_i32_0 : i32, i32
  }
  func.func @transform_2(%arg0: i32, %arg1: i32) -> (i32, i32) {
    %c0_i32 = arith.constant 0 : i32
    %c0_i32_0 = arith.constant 0 : i32
    %c0_i32_1 = arith.constant 0 : i32
    return %c0_i32, %c0_i32_0 : i32, i32
  }
  func.func @transform_3(%arg0: i32, %arg1: i32) -> (i32, i32, i32) {
    %c0_i32 = arith.constant 0 : i32
    %c0_i32_0 = arith.constant 0 : i32
    %c0_i32_1 = arith.constant 0 : i32
    return %arg0, %c0_i32, %c0_i32_0 : i32, i32, i32
  }
  func.func @transform_4(%arg0: i32, %arg1: i32) -> (i32, i32) {
    %c0_i32 = arith.constant 0 : i32
    %c0_i32_0 = arith.constant 0 : i32
    %c0_i32_1 = arith.constant 0 : i32
    return %c0_i32, %c0_i32_0 : i32, i32
  }
  func.func @transform_5(%arg0: i32, %arg1: i32) -> (i32, i32) {
    %c0_i32 = arith.constant 0 : i32
    %c0_i32_0 = arith.constant 0 : i32
    %c0_i32_1 = arith.constant 0 : i32
    return %c0_i32, %c0_i32_0 : i32, i32
  }
  func.func @transform_6(%arg0: i32, %arg1: i32) -> (i32, i32) {
    %c0_i32 = arith.constant 0 : i32
    %c0_i32_0 = arith.constant 0 : i32
    %c0_i32_1 = arith.constant 0 : i32
    return %c0_i32, %c0_i32_0 : i32, i32
  }
  func.func @transform_7(%arg0: i32, %arg1: i32) -> (i32, i32) {
    %c0_i32 = arith.constant 0 : i32
    %c0_i32_0 = arith.constant 0 : i32
    %c0_i32_1 = arith.constant 0 : i32
    return %c0_i32, %c0_i32_0 : i32, i32
  }
  func.func @transform_8(%arg0: i32, %arg1: i32) -> (i32, i32) {
    %c0_i32 = arith.constant 0 : i32
    %c0_i32_0 = arith.constant 0 : i32
    %c0_i32_1 = arith.constant 0 : i32
    return %c0_i32, %c0_i32_0 : i32, i32
  }
  func.func @transform_9(%arg0: i32, %arg1: i32) -> (i32, i32, i32) {
    %c0_i32 = arith.constant 0 : i32
    %c0_i32_0 = arith.constant 0 : i32
    %c0_i32_1 = arith.constant 0 : i32
    return %arg0, %c0_i32, %c0_i32_0 : i32, i32, i32
  }
}

module attributes {stable_mosaic.version = 11 : i64} {
  func.func @timm_model_kernel(%arg0: i32, %arg1: i32, %arg2: memref<1x4x128xf32, #tpu.memory_space<vmem>>, %arg3: memref<32x4xf32, #tpu.memory_space<vmem>>, %arg4: memref<32x1xf32, #tpu.memory_space<vmem>>, %arg5: memref<1x8x1xf32, #tpu.memory_space<vmem>>, %arg6: memref<8x32xf32, #tpu.memory_space<vmem>>, %arg7: memref<8x8xf32, #tpu.memory_space<vmem>>, %arg8: memref<8x1xf32, #tpu.memory_space<vmem>>, %arg9: memref<8x1xf32, #tpu.memory_space<vmem>>, %arg10: memref<1x1xf32, #tpu.memory_space<smem>>, %arg11: memref<1x1x1xf32, #tpu.memory_space<vmem>>, %arg12: memref<32x128xf32, #tpu.memory_space<vmem>>) attributes {dimension_semantics = [#tpu.dimension_semantics<parallel>, #tpu.dimension_semantics<arbitrary>], iteration_bounds = array<i64: 2, 2>, scalar_prefetch = 0 : i64, scratch_operands = 1 : i64, tpu.core_type = #tpu.core_type<tc>, window_params = [{transform_indices = @transform_0, window_bounds = array<i64: 1, 4, 128>}, {pipeline_mode = #tpu.pipeline_mode<synchronous>, transform_indices = @transform_1, window_bounds = array<i64: 32, 4>}, {pipeline_mode = #tpu.pipeline_mode<synchronous>, transform_indices = @transform_2, window_bounds = array<i64: 32, 1>}, {transform_indices = @transform_3, window_bounds = array<i64: 1, 8, 1>}, {pipeline_mode = #tpu.pipeline_mode<synchronous>, transform_indices = @transform_4, window_bounds = array<i64: 8, 32>}, {pipeline_mode = #tpu.pipeline_mode<synchronous>, transform_indices = @transform_5, window_bounds = array<i64: 8, 8>}, {pipeline_mode = #tpu.pipeline_mode<synchronous>, transform_indices = @transform_6, window_bounds = array<i64: 8, 1>}, {pipeline_mode = #tpu.pipeline_mode<synchronous>, transform_indices = @transform_7, window_bounds = array<i64: 8, 1>}, {transform_indices = @transform_8, window_bounds = array<i64: 1, 1>}, {transform_indices = @transform_9, window_bounds = array<i64: 1, 1, 1>}]} {
    %c0_i32 = arith.constant 0 : i32
    %0 = arith.cmpi eq, %arg1, %c0_i32 : i32
    %1 = arith.extui %0 : i1 to i32
    %c0_i32_0 = arith.constant 0 : i32
    %2 = arith.cmpi ne, %1, %c0_i32_0 : i32
    scf.if %2 {
      %cst_13 = arith.constant 0.000000e+00 : f32
      %18 = vector.broadcast %cst_13 : f32 to vector<32x128xf32>
      %c0_14 = arith.constant 0 : index
      %c0_15 = arith.constant 0 : index
      %19 = vector.load %arg12[%c0_14, %c0_15] : memref<32x128xf32, #tpu.memory_space<vmem>>, vector<32x128xf32>
      tpu.vector_store %arg12[%c0_14, %c0_15], %18 {strides = array<i32>} : memref<32x128xf32, #tpu.memory_space<vmem>>, vector<32x128xf32>,
    } else {
    }
    %c0 = arith.constant 0 : index
    %c0_1 = arith.constant 0 : index
    %c0_2 = arith.constant 0 : index
    %3 = vector.load %arg2[%c0, %c0_1, %c0_2] : memref<1x4x128xf32, #tpu.memory_space<vmem>>, vector<1x4x128xf32>
    %4 = vector.shape_cast %3 : vector<1x4x128xf32> to vector<4x128xf32>
    %c0_3 = arith.constant 0 : index
    %c0_4 = arith.constant 0 : index
    %5 = vector.load %arg3[%c0_3, %c0_4] : memref<32x4xf32, #tpu.memory_space<vmem>>, vector<32x4xf32>
    %cst = arith.constant dense<0.000000e+00> : vector<32x128xf32>
    %6 = tpu.matmul %5, %4, %cst {dimension_numbers = #tpu.dot_dimension_numbers<[1], [0], [0], [1], [0, 0, 1, 1], [], []>} : vector<32x4xf32>, vector<4x128xf32>, vector<32x128xf32> -> vector<32x128xf32>
    %c0_5 = arith.constant 0 : index
    %c0_6 = arith.constant 0 : index
    %7 = vector.load %arg4[%c0_5, %c0_6] : memref<32x1xf32, #tpu.memory_space<vmem>>, vector<32x1xf32>
    %8 = vector.broadcast %7 : vector<32x1xf32> to vector<32x128xf32>
    %9 = arith.addf %6, %8 : vector<32x128xf32>
    %cst_7 = arith.constant 0.000000e+00 : f32
    %10 = vector.broadcast %cst_7 : f32 to vector<32x128xf32>
    %11 = arith.maximumf %9, %10 : vector<32x128xf32>
    %c0_8 = arith.constant 0 : index
    %c0_9 = arith.constant 0 : index
    %12 = vector.load %arg12[%c0_8, %c0_9] : memref<32x128xf32, #tpu.memory_space<vmem>>, vector<32x128xf32>
    %13 = arith.addf %12, %11 : vector<32x128xf32>
    %c0_10 = arith.constant 0 : index
    %c0_11 = arith.constant 0 : index
    %14 = vector.load %arg12[%c0_10, %c0_11] : memref<32x128xf32, #tpu.memory_space<vmem>>, vector<32x128xf32>
    tpu.vector_store %arg12[%c0_10, %c0_11], %13 {strides = array<i32>} : memref<32x128xf32, #tpu.memory_space<vmem>>, vector<32x128xf32>,
    %c1_i32 = arith.constant 1 : i32
    %15 = arith.cmpi eq, %arg1, %c1_i32 : i32
    %16 = arith.extui %15 : i1 to i32
    %c0_i32_12 = arith.constant 0 : i32
    %17 = arith.cmpi ne, %16, %c0_i32_12 : i32
    scf.if %17 {
      %c0_13 = arith.constant 0 : index
      %c0_14 = arith.constant 0 : index
      %18 = vector.load %arg12[%c0_13, %c0_14] : memref<32x128xf32, #tpu.memory_space<vmem>>, vector<32x128xf32>
      %cst_15 = arith.constant dense<0.000000e+00> : vector<32xf32>
      %19 = vector.multi_reduction <add>, %18, %cst_15 [1] : vector<32x128xf32> to vector<32xf32>
      %20 = vector.shape_cast %19 : vector<32xf32> to vector<32x1xf32>
      %cst_16 = arith.constant 3.906250e-03 : f32
      %21 = vector.broadcast %cst_16 : f32 to vector<32x1xf32>
      %22 = arith.mulf %20, %21 : vector<32x1xf32>
      %c0_17 = arith.constant 0 : index
      %c0_18 = arith.constant 0 : index
      %23 = vector.load %arg6[%c0_17, %c0_18] : memref<8x32xf32, #tpu.memory_space<vmem>>, vector<8x32xf32>
      %cst_19 = arith.constant dense<0.000000e+00> : vector<8x1xf32>
      %24 = tpu.matmul %23, %22, %cst_19 {dimension_numbers = #tpu.dot_dimension_numbers<[1], [0], [0], [1], [0, 0, 1, 1], [], []>} : vector<8x32xf32>, vector<32x1xf32>, vector<8x1xf32> -> vector<8x1xf32>
      %c0_20 = arith.constant 0 : index
      %c0_21 = arith.constant 0 : index
      %25 = vector.load %arg7[%c0_20, %c0_21] : memref<8x8xf32, #tpu.memory_space<vmem>>, vector<8x8xf32>
      %c0_22 = arith.constant 0 : index
      %c0_23 = arith.constant 0 : index
      %c0_24 = arith.constant 0 : index
      %26 = vector.load %arg5[%c0_22, %c0_23, %c0_24] : memref<1x8x1xf32, #tpu.memory_space<vmem>>, vector<1x8x1xf32>
      %27 = vector.shape_cast %26 : vector<1x8x1xf32> to vector<8x1xf32>
      %cst_25 = arith.constant dense<0.000000e+00> : vector<8x1xf32>
      %28 = tpu.matmul %25, %27, %cst_25 {dimension_numbers = #tpu.dot_dimension_numbers<[1], [0], [0], [1], [0, 0, 1, 1], [], []>} : vector<8x8xf32>, vector<8x1xf32>, vector<8x1xf32> -> vector<8x1xf32>
      %29 = arith.addf %24, %28 : vector<8x1xf32>
      %c0_26 = arith.constant 0 : index
      %c0_27 = arith.constant 0 : index
      %30 = vector.load %arg8[%c0_26, %c0_27] : memref<8x1xf32, #tpu.memory_space<vmem>>, vector<8x1xf32>
      %31 = arith.addf %29, %30 : vector<8x1xf32>
      %cst_28 = arith.constant 0.000000e+00 : f32
      %32 = vector.broadcast %cst_28 : f32 to vector<8x1xf32>
      %33 = arith.maximumf %31, %32 : vector<8x1xf32>
      %c0_29 = arith.constant 0 : index
      %c0_30 = arith.constant 0 : index
      %34 = vector.load %arg9[%c0_29, %c0_30] : memref<8x1xf32, #tpu.memory_space<vmem>>, vector<8x1xf32>
      %35 = arith.mulf %33, %34 : vector<8x1xf32>
      %cst_31 = arith.constant dense<0.000000e+00> : vector<1xf32>
      %36 = vector.multi_reduction <add>, %35, %cst_31 [0] : vector<8x1xf32> to vector<1xf32>
      %37 = vector.shape_cast %36 : vector<1xf32> to vector<1x1xf32>
      %c0_32 = arith.constant 0 : index
      %c0_33 = arith.constant 0 : index
      %38 = memref.load %arg10[%c0_32, %c0_33] : memref<1x1xf32, #tpu.memory_space<smem>>
      %39 = vector.broadcast %38 : f32 to vector<1x1xf32>
      %40 = arith.addf %37, %39 : vector<1x1xf32>
      %41 = arith.negf %40 : vector<1x1xf32>
      %42 = math.exp %41 : vector<1x1xf32>
      %cst_34 = arith.constant 1.000000e+00 : f32
      %43 = vector.broadcast %cst_34 : f32 to vector<1x1xf32>
      %44 = arith.addf %43, %42 : vector<1x1xf32>
      %45 = arith.divf %43, %44 : vector<1x1xf32>
      %c0_35 = arith.constant 0 : index
      %c0_36 = arith.constant 0 : index
      %c0_37 = arith.constant 0 : index
      %46 = vector.load %arg11[%c0_35, %c0_36, %c0_37] : memref<1x1x1xf32, #tpu.memory_space<vmem>>, vector<1x1x1xf32>
      %47 = vector.shape_cast %46 : vector<1x1x1xf32> to vector<1x1xf32>
      %48 = vector.shape_cast %45 : vector<1x1xf32> to vector<1x1x1xf32>
      tpu.vector_store %arg11[%c0_35, %c0_36, %c0_37], %48 {strides = array<i32>} : memref<1x1x1xf32, #tpu.memory_space<vmem>>, vector<1x1x1xf32>,
    } else {
    }
    return
  }
  func.func @transform_0(%arg0: i32, %arg1: i32) -> (i32, i32, i32) {
    %c0_i32 = arith.constant 0 : i32
    %c0_i32_0 = arith.constant 0 : i32
    return %arg0, %c0_i32, %arg1 : i32, i32, i32
  }
  func.func @transform_1(%arg0: i32, %arg1: i32) -> (i32, i32) {
    %c0_i32 = arith.constant 0 : i32
    %c0_i32_0 = arith.constant 0 : i32
    %c0_i32_1 = arith.constant 0 : i32
    return %c0_i32, %c0_i32_0 : i32, i32
  }
  func.func @transform_2(%arg0: i32, %arg1: i32) -> (i32, i32) {
    %c0_i32 = arith.constant 0 : i32
    %c0_i32_0 = arith.constant 0 : i32
    %c0_i32_1 = arith.constant 0 : i32
    return %c0_i32, %c0_i32_0 : i32, i32
  }
  func.func @transform_3(%arg0: i32, %arg1: i32) -> (i32, i32, i32) {
    %c0_i32 = arith.constant 0 : i32
    %c0_i32_0 = arith.constant 0 : i32
    %c0_i32_1 = arith.constant 0 : i32
    return %arg0, %c0_i32, %c0_i32_0 : i32, i32, i32
  }
  func.func @transform_4(%arg0: i32, %arg1: i32) -> (i32, i32) {
    %c0_i32 = arith.constant 0 : i32
    %c0_i32_0 = arith.constant 0 : i32
    %c0_i32_1 = arith.constant 0 : i32
    return %c0_i32, %c0_i32_0 : i32, i32
  }
  func.func @transform_5(%arg0: i32, %arg1: i32) -> (i32, i32) {
    %c0_i32 = arith.constant 0 : i32
    %c0_i32_0 = arith.constant 0 : i32
    %c0_i32_1 = arith.constant 0 : i32
    return %c0_i32, %c0_i32_0 : i32, i32
  }
  func.func @transform_6(%arg0: i32, %arg1: i32) -> (i32, i32) {
    %c0_i32 = arith.constant 0 : i32
    %c0_i32_0 = arith.constant 0 : i32
    %c0_i32_1 = arith.constant 0 : i32
    return %c0_i32, %c0_i32_0 : i32, i32
  }
  func.func @transform_7(%arg0: i32, %arg1: i32) -> (i32, i32) {
    %c0_i32 = arith.constant 0 : i32
    %c0_i32_0 = arith.constant 0 : i32
    %c0_i32_1 = arith.constant 0 : i32
    return %c0_i32, %c0_i32_0 : i32, i32
  }
  func.func @transform_8(%arg0: i32, %arg1: i32) -> (i32, i32) {
    %c0_i32 = arith.constant 0 : i32
    %c0_i32_0 = arith.constant 0 : i32
    %c0_i32_1 = arith.constant 0 : i32
    return %c0_i32, %c0_i32_0 : i32, i32
  }
  func.func @transform_9(%arg0: i32, %arg1: i32) -> (i32, i32, i32) {
    %c0_i32 = arith.constant 0 : i32
    %c0_i32_0 = arith.constant 0 : i32
    %c0_i32_1 = arith.constant 0 : i32
    return %arg0, %c0_i32, %c0_i32_0 : i32, i32, i32
  }
}

</mosaic_0001>

<bundles_post_ra>
// kernel: tpu_custom_call.1
= control target key start
LH: loop header
LB: loop body
LE: loop exit
PB: predicated region body
PF: predicated region fallthrough
CT: control target
= control target key end

     0   :  { %s1009_s11 = smov 0   ;;  %s1011_s12 = smov 0   ;;  %s1118_s0 = inlined_call_operand.vmem [shape: f32[2,4,256], index: 0, kind: input, shape index: {}]   ;;  %s1119_s1 = inlined_call_operand.vmem [shape: f32[32,4], index: 1, kind: input, shape index: {}]   ;;  %s1120_s2 = inlined_call_operand.vmem [shape: f32[32,1], index: 2, kind: input, shape index: {}]   ;;  %s1121_s3 = inlined_call_operand.vmem [shape: f32[2,8,1], index: 3, kind: input, shape index: {}]   ;;  %s1122_s4 = inlined_call_operand.vmem [shape: f32[8,32], index: 4, kind: input, shape index: {}]   ;;  %s1123_s5 = inlined_call_operand.vmem [shape: f32[8,8], index: 5, kind: input, shape index: {}]   ;;  %s1124_s6 = inlined_call_operand.vmem [shape: f32[8,1], index: 6, kind: input, shape index: {}]   ;;  %s1125_s7 = inlined_call_operand.vmem [shape: f32[8,1], index: 7, kind: input, shape index: {}]   ;;  %s1126_s8 = inlined_call_operand.<no memory space> [shape: f32[1,1], index: 8, kind: input, shape index: {}]   ;;  %s1127_s9 = inlined_call_operand.vmem [shape: f32[2,1,1], index: 9, kind: output, shape index: {}]  }
   0x1   :  { %14 = sst [smem:[#allocation3]] %s1126_s8  ;;  %s1013_s13 = smov 0  }
   0x2   :  { %s1015_s14 = smov 0   ;;  %s1017_s15 = smov 0  }
   0x3 LB: > { %s29_s8 = sadd.s32 1, %s941_s13  ;;  %s32_s16 = sadd.s32 1, %s945_s14  ;;  %s949_s15 = sphi %s1017_s15, %s20_s15   ;;  %s945_s14 = sphi %s1015_s14, %s1131_s14   ;;  %s941_s13 = sphi %s1013_s13, %s1130_s13   ;;  %s937_s12 = sphi %s1011_s12, %s1129_s12   ;;  %s933_s11 = sphi %s1009_s11, %s1128_s11  }
   0x4   : > { %p30_p0 = scmp.ge.s32.totalorder %s29_s8, 2  ;;  %p800_p1 = scmp.ge.s32.totalorder %s949_s15, 1 }
   0x5   : > { %p314_p2 = scmp.lt.s32.totalorder %s949_s15, 5 }
   0x6   : > { %s1133_s8 = smov (%p30_p0, %s29_s8), 0  ;;  %s1135_s16 = smov (!%p30_p0, %s32_s16), %s945_s14 }
   0x7   : > { %p315_p3 = pnand %p800_p1, %p314_p2  ;;  %p34_p4 = scmp.ge.s32.totalorder %s1135_s16, 2 }
   0x8   : > { %p355_p5 = scmp.lt.s32.totalorder (!%p315_p3), %s937_s12, 1  ;;  %p357_p6 = scmp.lt.s32.totalorder (!%p315_p3), %s933_s11, 1 }
   0x9   : > { %s1137_s16 = smov (%p34_p4, %s1135_s16), 0  ;;  %318 = sbr.rel (%p315_p3) target bundleno = 673 (0x2a1), region = 56 }
   0xa   : > { %p804_p7 = scmp.ne.s32.totalorder (!%p315_p3), %s933_s11, 0 }
  0x10   : > { %s1139_s12 = smov (!%p355_p5, %s937_s12), 1  ;;  %373 = sbr.rel (%p804_p7) target bundleno = 23 (0x17), region = 60 }
  0x11   : > { %s358_s17 = scalar_select %p357_p6, %s933_s11, 1 }
  0x12   : > { %s801_s18 = sshll.u32 %s1139_s12, 1  ;;  %s803_s19 = sshll.u32 %s1139_s12, 3  ;;  %v951_v0 = vmov (!%p804_p7), 0.0  }
  0x13   : > { %s360_s20 = sadd.s32 %s801_s18, %s358_s17  ;;  %s1050_s23 = scalar_lea.vmem %s1121_s3, %s803_s19  ;;  %374 = vst [vmem:[#allocation2] sm:$0xff] (!%p804_p7), %v951_v0  ;;  %375 = vst [vmem:[#allocation2 + $0x8] sm:$0xff] (!%p804_p7), %v951_v0 }
  0x14   : > { %s802_s24 = sshll.u32 %s360_s20, 2  ;;  %s369_s27 = scalar_lea.vmem %s1127_s9, %s1139_s12  ;;  %376 = vst [vmem:[#allocation2 + $0x10] sm:$0xff] (!%p804_p7), %v951_v0  ;;  %377 = vst [vmem:[#allocation2 + $0x18] sm:$0xff] (!%p804_p7), %v951_v0 }
  0x15   : > { %s362_s30 = scalar_lea.vmem %s1118_s0, %s802_s24 }
  0x17 PF: > { %v378_v1 = vld [vmem:[%s362_s30] sm:$0xf]  ;;  %vm420_vm0 = vcmask 1043456   ;;  %vm407_vm1 = vcmask 31744   ;;  %v381_v3 = vld [vmem:[%s1119_s1 + $0x10] sm:$0xff]  ;;  %v380_v4 = vld [vmem:[%s1119_s1 + $0x8] sm:$0xff] }
  0x18   : > { %v379_v2 = vld [vmem:[%s1119_s1] sm:$0xff]  ;;  %828 = vmatprep.subr.msk.mxu0 %vm420_vm0, %v378_v1  ;;  %858 = vmatprep.subr.msk.mxu1 %vm420_vm0, %v378_v1  ;;  %v382_v5 = vld [vmem:[%s1119_s1 + $0x18] sm:$0xff]  ;;  %v385_v6 = vld [vmem:[%s1120_s2 + $0x10] sm:$0xff]  ;;  %v952_v8 = vmov 0   ;;  %p810_p8 = scmp.ne.s32.totalorder %s933_s11, 1 }
  0x19   : > { %829 = vmatpush3.msk.msra.mxu0 %vm420_vm0, %v378_v1  ;;  %859 = vmatpush3.msk.msra.mxu1 %vm420_vm0, %v378_v1  ;;  %v383_v7 = vld [vmem:[%s1120_s2] sm:$0xff]  ;;  %v386_v9 = vld [vmem:[%s1120_s2 + $0x18] sm:$0xff]  ;;  %v384_v10 = vld [vmem:[%s1120_s2 + $0x8] sm:$0xff]  ;;  %v953_v39 = vmov (!%p810_p8), 0.0|0.0   ;;  %v954_v40 = vmov (!%p810_p8), 0.0   ;;  %vm548_vm2 = vcmask (!%p810_p8), 64512  }
  0x1a   : > { %830 = vmatprep.mubr.msk.f32.mxu0 %vm407_vm1, %v379_v2  ;;  %833 = vmatprep.mubr.msk.f32.mxu1 %vm407_vm1, %v381_v3  ;;  %v514_v21 = vld [vmem:[#allocation2 + $0x8] sm:$0xff]  ;;  %v513_v27 = vld [vmem:[#allocation2] sm:$0xff]  ;;  %vm955_vm3 = vmmov (!%p810_p8), 0   ;;  %vm622_vm4 = vcmask (!%p810_p8), 261120   ;;  %vm701_vm5 = vcmask (!%p810_p8), 7168   ;;  %s709_s26 = sld [smem:[#allocation3]] (!%p810_p8) }
  0x1b   : > { %831 = vmatmul.mubr.msk.f32.vlgmr.msra.gmra.mrb[0].mxu0 %vm407_vm1, %v380_v4  ;;  %834 = vmatmul.mubr.msk.f32.vlgmr.msra.gmra.mrb[0].mxu1 %vm407_vm1, %v382_v5  ;;  %v516_v22 = vld [vmem:[#allocation2 + $0x18] sm:$0xff]  ;;  %v515_v28 = vld [vmem:[#allocation2 + $0x10] sm:$0xff]  ;;  %v547_v41 = vld [vmem:[%s1050_s23] sm:$0xff] (!%p810_p8)  ;;  %vm718_vm6 = vcmask (!%p810_p8), 0  }
  0x1c   : > { %906 = vset.pattern.permute.xlu1 %v952_v8  ;;  %905 = vset.pattern.permute.xlu0 %v952_v8  ;;  %v546_v42 = vld [vmem:[%s1123_s5] sm:$0xff] (!%p810_p8) }
  0x1d   : > { %399 = vperm.xlu1 %906, %v385_v6   ;;  %389 = vperm.xlu0 %905, %v383_v7   ;;  %v545_v53 = vld [vmem:[%s1122_s4] sm:$0xff] (!%p810_p8) }
  0x1e   : > { %852 = vmatprep.subr.bf16.mxu1 (!%p810_p8), %v953_v39  ;;  %836 = vmatprep.subr.mxu0 (!%p810_p8), %v954_v40  ;;  %v696_v57 = vld [vmem:[%s1124_s6] sm:$0xff] (!%p810_p8) }
  0x1f   : > { %837 = vmatpush3.msra.mxu0 (!%p810_p8), %v547_v41  ;;  %838 = vmatprep.mubr.msk.f32.mxu0 (!%p810_p8), %vm955_vm3, %v954_v40  ;;  %v699_v61 = vld [vmem:[%s1125_s7] sm:$0xff] (!%p810_p8) }
  0x20   : > { %849 = vmatprep.mubr.msk.f32.mxu1 (!%p810_p8), %vm955_vm3, %v954_v40  ;;  %v710_v6 = vstv (!%p810_p8), %s709_s26 }
  0x21   : > { %404 = vperm.xlu1 %906, %v386_v9   ;;  %394 = vperm.xlu0 %905, %v384_v10  }
  0x9c   : > { %v400_v11 = vpop.permute.xlu1 %399  ;;  %v390_v12 = vpop.permute.xlu0 %389 }
  0xa0   : > { %v405_v13 = vpop.permute.xlu1 %404  ;;  %v395_v14 = vpop.permute.xlu0 %394 }
  0xee   : > { %v832_v15 = vpop.f32.mrb[0].mxu0  ;;  %v835_v16 = vpop.f32.mrb[0].mxu1 }
  0xef   : > { %v496_v17 = vadd.f32 %v832_v15, %v395_v14  ;;  %v506_v18 = vadd.f32 %v835_v16, %v405_v13  ;;  %v490_v19 = vpop.f32.mrb[1].mxu0  ;;  %v500_v20 = vpop.f32.mrb[1].mxu1  ;;  %839 = vmatmul.mubr.msk.f32.vlgmr.msra.gmra.mrb[0].mxu0 (!%p810_p8), %vm548_vm2, %v546_v42 }
  0xf0   : > { %v491_v23 = vadd.f32 %v490_v19, %v390_v12  ;;  %v501_v24 = vadd.f32 %v500_v20, %v400_v11  ;;  %528 = sbr.rel (%p810_p8) target bundleno = 673 (0x2a1), region = 64 }
  0xf1   : > { %v510_v25 = vmax.f32 %v496_v17, 0.0  ;;  %v512_v26 = vmax.f32 %v506_v18, 0.0 }
  0xf2   : > { %v509_v29 = vmax.f32 %v491_v23, 0.0  ;;  %v511_v30 = vmax.f32 %v501_v24, 0.0 }
  0xf3   : > { %v518_v31 = vadd.f32 %v514_v21, %v510_v25  ;;  %v520_v32 = vadd.f32 %v516_v22, %v512_v26 }
  0xf4   : > { %v517_v33 = vadd.f32 %v513_v27, %v509_v29  ;;  %v519_v34 = vadd.f32 %v515_v28, %v511_v30 }
  0xf5   : > { %522 = vst [vmem:[#allocation2 + $0x8] sm:$0xff] %v518_v31  ;;  %524 = vst [vmem:[#allocation2 + $0x18] sm:$0xff] %v520_v32 }
  0xf6   : > { %521 = vst [vmem:[#allocation2] sm:$0xff] %v517_v33  ;;  %523 = vst [vmem:[#allocation2 + $0x10] sm:$0xff] %v519_v34 }
  0xfc   : > { %v532_v37 = vld [vmem:[#allocation2 + $0x18] sm:$0xff]  ;;  %v530_v38 = vld [vmem:[#allocation2 + $0x8] sm:$0xff] }
  0xfd   : > { %v531_v35 = vld [vmem:[#allocation2 + $0x10] sm:$0xff]  ;;  %v529_v36 = vld [vmem:[#allocation2] sm:$0xff] }
  0xfe   : > { %537 = vadd.xlane.f32.xlu1 %v531_v35  ;;  %533 = vadd.xlane.f32.xlu0 %v529_v36 }
 0x102   : > { %539 = vadd.xlane.f32.xlu1 %v532_v37  ;;  %535 = vadd.xlane.f32.xlu0 %v530_v38 }
 0x18b   : > { %v538_v43 = vpop.xlane.xlu1 %537  ;;  %v534_v44 = vpop.xlane.xlu0 %533 }
 0x18c   : > { %v541_v47 = vmul.f32 0.00390625, %v534_v44  ;;  %v543_v49 = vmul.f32 0.00390625, %v538_v43 }
 0x18f   : > { %v540_v45 = vpop.xlane.xlu1 %539  ;;  %v536_v46 = vpop.xlane.xlu0 %535 }
 0x190   : > { %v542_v48 = vmul.f32 0.00390625, %v536_v46  ;;  %v544_v50 = vmul.f32 0.00390625, %v540_v45 }
 0x192   : > { %v853_v51 = vpack.c.bf16 %v542_v48, %v541_v47  ;;  %v856_v52 = vpack.c.bf16 %v544_v50, %v543_v49 }
 0x194   : > { %854 = vmatpush3.bf16.msra.mxu1 %v853_v51 }
 0x195   : > { %855 = vmatprep.subr.bf16.mxu1 %v953_v39 }
 0x198   : > { %857 = vmatpush3.bf16.msra.mxu1 %v856_v52 }
 0x19b   : > { %850 = vmatmul.mubr.msk.f32.vlgmr.msra.gmra.mrb[0].mxu1 %vm622_vm4, %v545_v53 }
 0x1c2   : > { %v618_v54 = vpop.f32.mrb[0].mxu0 }
 0x1c3   : > { %v840_v55 = vpop.f32.mrb[1].mxu0 }
 0x26e   : > { %v692_v56 = vpop.f32.mrb[0].mxu1 }
 0x26f   : > { %v693_v58 = vadd.f32 %v692_v56, %v618_v54  ;;  %v851_v59 = vpop.f32.mrb[1].mxu1 }
 0x271   : > { %v697_v60 = vadd.f32 %v696_v57, %v693_v58 }
 0x273   : > { %v698_v62 = vmax.f32 %v697_v60, 0.0 }
 0x275   : > { %v700_v63 = vmul.f32 %v699_v61, %v698_v62 }
 0x277   : > { %v702_v0 = vsel %vm701_vm5, %v700_v63, 0.0 }
 0x278   : > { %v703_v1 = vrot.slane %v702_v0, 4 }
 0x27a   : > { %v704_v2 = vadd.f32 %v703_v1, %v702_v0 }
 0x27c   : > { %v705_v3 = vrot.slane %v704_v2, 2 }
 0x27e   : > { %v706_v4 = vadd.f32 %v705_v3, %v704_v2 }
 0x280   : > { %v707_v5 = vrot.slane %v706_v4, 1 }
 0x282   : > { %v708_v7 = vadd.f32 %v707_v5, %v706_v4 }
 0x284   : > { %v711_v8 = vadd.f32 %v710_v6, %v708_v7 }
 0x286   : > { %v813_v9 = vmul.f32 -1.442695, %v711_v8 }
 0x288   : > { %907 = vpow2.f32 %v813_v9 }
 0x292   : > { %v908_v10 = vpop.eup %907 }
 0x293   : > { %v715_v11 = vadd.f32 1.0, %v908_v10 }
 0x295   : > { %909 = vrcp.f32 %v715_v11 }
 0x29f   : > { %v910_v12 = vpop.eup %909 }
 0x2a0   : > { %719 = vst.msk [vmem:[%s369_s27] sm:$0x1] %vm718_vm6, %v910_v12 }
 0x2a1 PF: > { %s20_s15 = sadd.s32 1, %s949_s15   ;;  %s1128_s11 = smov %s941_s13 }
 0x2a2   : > { %p17_p9 = scmp.ge.s32.totalorder %s20_s15, 6   ;;  %s1129_s12 = smov %s945_s14 }
 0x2a3   : > { %s1130_s13 = smov %s1133_s8  ;;  %s1131_s14 = smov %s1137_s16 }
 0x2a4   :  { %19 = sbr.rel (!%p17_p9) target bundleno = 3 (0x3), region = 97 }

// kernel: tpu_custom_call.1
= control target key start
LH: loop header
LB: loop body
LE: loop exit
PB: predicated region body
PF: predicated region fallthrough
CT: control target
= control target key end

     0   :  { %s1009_s11 = smov 0   ;;  %s1011_s12 = smov 0   ;;  %s1118_s0 = inlined_call_operand.vmem [shape: f32[2,4,256], index: 0, kind: input, shape index: {}]   ;;  %s1119_s1 = inlined_call_operand.vmem [shape: f32[32,4], index: 1, kind: input, shape index: {}]   ;;  %s1120_s2 = inlined_call_operand.vmem [shape: f32[32,1], index: 2, kind: input, shape index: {}]   ;;  %s1121_s3 = inlined_call_operand.vmem [shape: f32[2,8,1], index: 3, kind: input, shape index: {}]   ;;  %s1122_s4 = inlined_call_operand.vmem [shape: f32[8,32], index: 4, kind: input, shape index: {}]   ;;  %s1123_s5 = inlined_call_operand.vmem [shape: f32[8,8], index: 5, kind: input, shape index: {}]   ;;  %s1124_s6 = inlined_call_operand.vmem [shape: f32[8,1], index: 6, kind: input, shape index: {}]   ;;  %s1125_s7 = inlined_call_operand.vmem [shape: f32[8,1], index: 7, kind: input, shape index: {}]   ;;  %s1126_s8 = inlined_call_operand.<no memory space> [shape: f32[1,1], index: 8, kind: input, shape index: {}]   ;;  %s1127_s9 = inlined_call_operand.vmem [shape: f32[2,1,1], index: 9, kind: output, shape index: {}]  }
   0x1   :  { %14 = sst [smem:[#allocation3]] %s1126_s8  ;;  %s1013_s13 = smov 0  }
   0x2   :  { %s1015_s14 = smov 0   ;;  %s1017_s15 = smov 0  }
   0x3 LB: > { %s29_s8 = sadd.s32 1, %s941_s13  ;;  %s32_s16 = sadd.s32 1, %s945_s14  ;;  %s949_s15 = sphi %s1017_s15, %s20_s15   ;;  %s945_s14 = sphi %s1015_s14, %s1131_s14   ;;  %s941_s13 = sphi %s1013_s13, %s1130_s13   ;;  %s937_s12 = sphi %s1011_s12, %s1129_s12   ;;  %s933_s11 = sphi %s1009_s11, %s1128_s11  }
   0x4   : > { %p30_p0 = scmp.ge.s32.totalorder %s29_s8, 2  ;;  %p800_p1 = scmp.ge.s32.totalorder %s949_s15, 1 }
   0x5   : > { %p314_p2 = scmp.lt.s32.totalorder %s949_s15, 5 }
   0x6   : > { %s1133_s8 = smov (%p30_p0, %s29_s8), 0  ;;  %s1135_s16 = smov (!%p30_p0, %s32_s16), %s945_s14 }
   0x7   : > { %p315_p3 = pnand %p800_p1, %p314_p2  ;;  %p34_p4 = scmp.ge.s32.totalorder %s1135_s16, 2 }
   0x8   : > { %p355_p5 = scmp.lt.s32.totalorder (!%p315_p3), %s937_s12, 1  ;;  %p357_p6 = scmp.lt.s32.totalorder (!%p315_p3), %s933_s11, 1 }
   0x9   : > { %s1137_s16 = smov (%p34_p4, %s1135_s16), 0  ;;  %318 = sbr.rel (%p315_p3) target bundleno = 673 (0x2a1), region = 56 }
   0xa   : > { %p804_p7 = scmp.ne.s32.totalorder (!%p315_p3), %s933_s11, 0 }
  0x10   : > { %s1139_s12 = smov (!%p355_p5, %s937_s12), 1  ;;  %373 = sbr.rel (%p804_p7) target bundleno = 23 (0x17), region = 60 }
  0x11   : > { %s358_s17 = scalar_select %p357_p6, %s933_s11, 1 }
  0x12   : > { %s801_s18 = sshll.u32 %s1139_s12, 1  ;;  %s803_s19 = sshll.u32 %s1139_s12, 3  ;;  %v951_v0 = vmov (!%p804_p7), 0.0  }
  0x13   : > { %s360_s20 = sadd.s32 %s801_s18, %s358_s17  ;;  %s1050_s23 = scalar_lea.vmem %s1121_s3, %s803_s19  ;;  %374 = vst [vmem:[#allocation2] sm:$0xff] (!%p804_p7), %v951_v0  ;;  %375 = vst [vmem:[#allocation2 + $0x8] sm:$0xff] (!%p804_p7), %v951_v0 }
  0x14   : > { %s802_s24 = sshll.u32 %s360_s20, 2  ;;  %s369_s27 = scalar_lea.vmem %s1127_s9, %s1139_s12  ;;  %376 = vst [vmem:[#allocation2 + $0x10] sm:$0xff] (!%p804_p7), %v951_v0  ;;  %377 = vst [vmem:[#allocation2 + $0x18] sm:$0xff] (!%p804_p7), %v951_v0 }
  0x15   : > { %s362_s30 = scalar_lea.vmem %s1118_s0, %s802_s24 }
  0x17 PF: > { %v378_v1 = vld [vmem:[%s362_s30] sm:$0xf]  ;;  %vm420_vm0 = vcmask 1043456   ;;  %vm407_vm1 = vcmask 31744   ;;  %v381_v3 = vld [vmem:[%s1119_s1 + $0x10] sm:$0xff]  ;;  %v380_v4 = vld [vmem:[%s1119_s1 + $0x8] sm:$0xff] }
  0x18   : > { %v379_v2 = vld [vmem:[%s1119_s1] sm:$0xff]  ;;  %828 = vmatprep.subr.msk.mxu0 %vm420_vm0, %v378_v1  ;;  %858 = vmatprep.subr.msk.mxu1 %vm420_vm0, %v378_v1  ;;  %v382_v5 = vld [vmem:[%s1119_s1 + $0x18] sm:$0xff]  ;;  %v385_v6 = vld [vmem:[%s1120_s2 + $0x10] sm:$0xff]  ;;  %v952_v8 = vmov 0   ;;  %p810_p8 = scmp.ne.s32.totalorder %s933_s11, 1 }
  0x19   : > { %829 = vmatpush3.msk.msra.mxu0 %vm420_vm0, %v378_v1  ;;  %859 = vmatpush3.msk.msra.mxu1 %vm420_vm0, %v378_v1  ;;  %v383_v7 = vld [vmem:[%s1120_s2] sm:$0xff]  ;;  %v386_v9 = vld [vmem:[%s1120_s2 + $0x18] sm:$0xff]  ;;  %v384_v10 = vld [vmem:[%s1120_s2 + $0x8] sm:$0xff]  ;;  %v953_v39 = vmov (!%p810_p8), 0.0|0.0   ;;  %v954_v40 = vmov (!%p810_p8), 0.0   ;;  %vm548_vm2 = vcmask (!%p810_p8), 64512  }
  0x1a   : > { %830 = vmatprep.mubr.msk.f32.mxu0 %vm407_vm1, %v379_v2  ;;  %833 = vmatprep.mubr.msk.f32.mxu1 %vm407_vm1, %v381_v3  ;;  %v514_v21 = vld [vmem:[#allocation2 + $0x8] sm:$0xff]  ;;  %v513_v27 = vld [vmem:[#allocation2] sm:$0xff]  ;;  %vm955_vm3 = vmmov (!%p810_p8), 0   ;;  %vm622_vm4 = vcmask (!%p810_p8), 261120   ;;  %vm701_vm5 = vcmask (!%p810_p8), 7168   ;;  %s709_s26 = sld [smem:[#allocation3]] (!%p810_p8) }
  0x1b   : > { %831 = vmatmul.mubr.msk.f32.vlgmr.msra.gmra.mrb[0].mxu0 %vm407_vm1, %v380_v4  ;;  %834 = vmatmul.mubr.msk.f32.vlgmr.msra.gmra.mrb[0].mxu1 %vm407_vm1, %v382_v5  ;;  %v516_v22 = vld [vmem:[#allocation2 + $0x18] sm:$0xff]  ;;  %v515_v28 = vld [vmem:[#allocation2 + $0x10] sm:$0xff]  ;;  %v547_v41 = vld [vmem:[%s1050_s23] sm:$0xff] (!%p810_p8)  ;;  %vm718_vm6 = vcmask (!%p810_p8), 0  }
  0x1c   : > { %906 = vset.pattern.permute.xlu1 %v952_v8  ;;  %905 = vset.pattern.permute.xlu0 %v952_v8  ;;  %v546_v42 = vld [vmem:[%s1123_s5] sm:$0xff] (!%p810_p8) }
  0x1d   : > { %399 = vperm.xlu1 %906, %v385_v6   ;;  %389 = vperm.xlu0 %905, %v383_v7   ;;  %v545_v53 = vld [vmem:[%s1122_s4] sm:$0xff] (!%p810_p8) }
  0x1e   : > { %852 = vmatprep.subr.bf16.mxu1 (!%p810_p8), %v953_v39  ;;  %836 = vmatprep.subr.mxu0 (!%p810_p8), %v954_v40  ;;  %v696_v57 = vld [vmem:[%s1124_s6] sm:$0xff] (!%p810_p8) }
  0x1f   : > { %837 = vmatpush3.msra.mxu0 (!%p810_p8), %v547_v41  ;;  %838 = vmatprep.mubr.msk.f32.mxu0 (!%p810_p8), %vm955_vm3, %v954_v40  ;;  %v699_v61 = vld [vmem:[%s1125_s7] sm:$0xff] (!%p810_p8) }
  0x20   : > { %849 = vmatprep.mubr.msk.f32.mxu1 (!%p810_p8), %vm955_vm3, %v954_v40  ;;  %v710_v6 = vstv (!%p810_p8), %s709_s26 }
  0x21   : > { %404 = vperm.xlu1 %906, %v386_v9   ;;  %394 = vperm.xlu0 %905, %v384_v10  }
  0x9c   : > { %v400_v11 = vpop.permute.xlu1 %399  ;;  %v390_v12 = vpop.permute.xlu0 %389 }
  0xa0   : > { %v405_v13 = vpop.permute.xlu1 %404  ;;  %v395_v14 = vpop.permute.xlu0 %394 }
  0xee   : > { %v832_v15 = vpop.f32.mrb[0].mxu0  ;;  %v835_v16 = vpop.f32.mrb[0].mxu1 }
  0xef   : > { %v496_v17 = vadd.f32 %v832_v15, %v395_v14  ;;  %v506_v18 = vadd.f32 %v835_v16, %v405_v13  ;;  %v490_v19 = vpop.f32.mrb[1].mxu0  ;;  %v500_v20 = vpop.f32.mrb[1].mxu1  ;;  %839 = vmatmul.mubr.msk.f32.vlgmr.msra.gmra.mrb[0].mxu0 (!%p810_p8), %vm548_vm2, %v546_v42 }
  0xf0   : > { %v491_v23 = vadd.f32 %v490_v19, %v390_v12  ;;  %v501_v24 = vadd.f32 %v500_v20, %v400_v11  ;;  %528 = sbr.rel (%p810_p8) target bundleno = 673 (0x2a1), region = 64 }
  0xf1   : > { %v510_v25 = vmax.f32 %v496_v17, 0.0  ;;  %v512_v26 = vmax.f32 %v506_v18, 0.0 }
  0xf2   : > { %v509_v29 = vmax.f32 %v491_v23, 0.0  ;;  %v511_v30 = vmax.f32 %v501_v24, 0.0 }
  0xf3   : > { %v518_v31 = vadd.f32 %v514_v21, %v510_v25  ;;  %v520_v32 = vadd.f32 %v516_v22, %v512_v26 }
  0xf4   : > { %v517_v33 = vadd.f32 %v513_v27, %v509_v29  ;;  %v519_v34 = vadd.f32 %v515_v28, %v511_v30 }
  0xf5   : > { %522 = vst [vmem:[#allocation2 + $0x8] sm:$0xff] %v518_v31  ;;  %524 = vst [vmem:[#allocation2 + $0x18] sm:$0xff] %v520_v32 }
  0xf6   : > { %521 = vst [vmem:[#allocation2] sm:$0xff] %v517_v33  ;;  %523 = vst [vmem:[#allocation2 + $0x10] sm:$0xff] %v519_v34 }
  0xfc   : > { %v532_v37 = vld [vmem:[#allocation2 + $0x18] sm:$0xff]  ;;  %v530_v38 = vld [vmem:[#allocation2 + $0x8] sm:$0xff] }
  0xfd   : > { %v531_v35 = vld [vmem:[#allocation2 + $0x10] sm:$0xff]  ;;  %v529_v36 = vld [vmem:[#allocation2] sm:$0xff] }
  0xfe   : > { %537 = vadd.xlane.f32.xlu1 %v531_v35  ;;  %533 = vadd.xlane.f32.xlu0 %v529_v36 }
 0x102   : > { %539 = vadd.xlane.f32.xlu1 %v532_v37  ;;  %535 = vadd.xlane.f32.xlu0 %v530_v38 }
 0x18b   : > { %v538_v43 = vpop.xlane.xlu1 %537  ;;  %v534_v44 = vpop.xlane.xlu0 %533 }
 0x18c   : > { %v541_v47 = vmul.f32 0.00390625, %v534_v44  ;;  %v543_v49 = vmul.f32 0.00390625, %v538_v43 }
 0x18f   : > { %v540_v45 = vpop.xlane.xlu1 %539  ;;  %v536_v46 = vpop.xlane.xlu0 %535 }
 0x190   : > { %v542_v48 = vmul.f32 0.00390625, %v536_v46  ;;  %v544_v50 = vmul.f32 0.00390625, %v540_v45 }
 0x192   : > { %v853_v51 = vpack.c.bf16 %v542_v48, %v541_v47  ;;  %v856_v52 = vpack.c.bf16 %v544_v50, %v543_v49 }
 0x194   : > { %854 = vmatpush3.bf16.msra.mxu1 %v853_v51 }
 0x195   : > { %855 = vmatprep.subr.bf16.mxu1 %v953_v39 }
 0x198   : > { %857 = vmatpush3.bf16.msra.mxu1 %v856_v52 }
 0x19b   : > { %850 = vmatmul.mubr.msk.f32.vlgmr.msra.gmra.mrb[0].mxu1 %vm622_vm4, %v545_v53 }
 0x1c2   : > { %v618_v54 = vpop.f32.mrb[0].mxu0 }
 0x1c3   : > { %v840_v55 = vpop.f32.mrb[1].mxu0 }
 0x26e   : > { %v692_v56 = vpop.f32.mrb[0].mxu1 }
 0x26f   : > { %v693_v58 = vadd.f32 %v692_v56, %v618_v54  ;;  %v851_v59 = vpop.f32.mrb[1].mxu1 }
 0x271   : > { %v697_v60 = vadd.f32 %v696_v57, %v693_v58 }
 0x273   : > { %v698_v62 = vmax.f32 %v697_v60, 0.0 }
 0x275   : > { %v700_v63 = vmul.f32 %v699_v61, %v698_v62 }
 0x277   : > { %v702_v0 = vsel %vm701_vm5, %v700_v63, 0.0 }
 0x278   : > { %v703_v1 = vrot.slane %v702_v0, 4 }
 0x27a   : > { %v704_v2 = vadd.f32 %v703_v1, %v702_v0 }
 0x27c   : > { %v705_v3 = vrot.slane %v704_v2, 2 }
 0x27e   : > { %v706_v4 = vadd.f32 %v705_v3, %v704_v2 }
 0x280   : > { %v707_v5 = vrot.slane %v706_v4, 1 }
 0x282   : > { %v708_v7 = vadd.f32 %v707_v5, %v706_v4 }
 0x284   : > { %v711_v8 = vadd.f32 %v710_v6, %v708_v7 }
 0x286   : > { %v813_v9 = vmul.f32 -1.442695, %v711_v8 }
 0x288   : > { %907 = vpow2.f32 %v813_v9 }
 0x292   : > { %v908_v10 = vpop.eup %907 }
 0x293   : > { %v715_v11 = vadd.f32 1.0, %v908_v10 }
 0x295   : > { %909 = vrcp.f32 %v715_v11 }
 0x29f   : > { %v910_v12 = vpop.eup %909 }
 0x2a0   : > { %719 = vst.msk [vmem:[%s369_s27] sm:$0x1] %vm718_vm6, %v910_v12 }
 0x2a1 PF: > { %s20_s15 = sadd.s32 1, %s949_s15   ;;  %s1128_s11 = smov %s941_s13 }
 0x2a2   : > { %p17_p9 = scmp.ge.s32.totalorder %s20_s15, 6   ;;  %s1129_s12 = smov %s945_s14 }
 0x2a3   : > { %s1130_s13 = smov %s1133_s8  ;;  %s1131_s14 = smov %s1137_s16 }
 0x2a4   :  { %19 = sbr.rel (!%p17_p9) target bundleno = 3 (0x3), region = 97 }

</bundles_post_ra>
